<compile_context>
chip_gen: v7x
topology: tpu7x:2x2x1
jax: 0.10.0
libtpu: 0.0.40
codegen_flags: <defaults>
</compile_context>

<pallas_src>
import jax
import jax.numpy as jnp
from jax import lax
from jax.experimental import pallas as pl
from jax.experimental.pallas import tpu as pltpu

HIDDEN_SIZE = 200   # fixed in the PyTorch module's __init__
EPS = 1e-5
DROP_P = 0.5
_LANE = 128


def _round_up(n, m):
    return (n + m - 1) // m * m


def _batchnorm_train(y):
    """BatchNorm1d training mode: batch stats, biased variance, gamma=1, beta=0."""
    mean = jnp.mean(y, axis=0, keepdims=True)
    d = y - mean
    var = jnp.mean(d * d, axis=0, keepdims=True)
    return d * lax.rsqrt(var + EPS)


def _sfe_kernel(x_ref, w1_ref, b1_ref, w2_ref, b2_ref, m1_ref, m2_ref, o_ref):
    # ---- fc1 + ReLU (lane-dense padded hidden dim) -------------------------
    h = jnp.dot(x_ref[...], w1_ref[...], preferred_element_type=jnp.float32)
    h = jnp.maximum(h + b1_ref[...], 0.0)
    # ---- Dropout(0.5): mask values are {0, 1/(1-p)}, precomputed on host ---
    h = h * m1_ref[...]
    # ---- BatchNorm1d over the hidden features (padded zero cols stay zero) -
    h = _batchnorm_train(h)
    # ---- fc2 + ReLU ---------------------------------------------------------
    z = jnp.dot(h, w2_ref[...], preferred_element_type=jnp.float32)
    z = jnp.maximum(z + b2_ref[...], 0.0)
    # ---- Dropout(0.5) + BatchNorm1d over the output features ---------------
    z = z * m2_ref[...]
    z = _batchnorm_train(z)
    o_ref[...] = z.astype(o_ref.dtype)


@jax.jit
def shared_feature_extractor_groups(x, w1, b1, w2, b2, key):
    """Run the module on G independent mini-batches.

    x:  (G, B, emb)   float32  -- G independent forward passes (BN stats per group)
    w1: (emb, 200), b1: (1, 200), w2: (200, nout), b2: (1, nout)
    key: jax.random key used for the (training-mode) dropout masks.
    Returns (G, B, nout) float32.
    """
    G, B, emb = x.shape
    H = w1.shape[1]
    nout = w2.shape[1]
    Hp = _round_up(H, _LANE)        # 200 -> 256: lane-dense hidden dim
    noutp = _round_up(nout, _LANE)  # lane-dense output dim

    # Zero-padding keeps numerics identical (padded columns stay exactly 0).
    w1p = jnp.pad(w1, ((0, 0), (0, Hp - H)))
    b1p = jnp.pad(b1.reshape(1, H), ((0, 0), (0, Hp - H)))
    w2p = jnp.pad(w2, ((0, Hp - H), (0, noutp - nout)))
    b2p = jnp.pad(b2.reshape(1, nout), ((0, 0), (0, noutp - nout)))

    # Training-mode dropout masks, pre-scaled by 1/(1-p); drawn on the host side so
    # the kernel stays portable (no TPU-only PRNG primitives).
    k1, k2 = jax.random.split(key)
    scale = 1.0 / (1.0 - DROP_P)
    m1 = jax.random.bernoulli(k1, 1.0 - DROP_P, (G, B, Hp)).astype(jnp.float32) * scale
    m2 = jax.random.bernoulli(k2, 1.0 - DROP_P, (G, B, noutp)).astype(jnp.float32) * scale

    flops = 2 * G * B * (emb * Hp + Hp * noutp)
    transcendentals = G * (Hp + noutp)  # one rsqrt per BN column per group
    bytes_accessed = 4 * (x.size + w1p.size + b1p.size + w2p.size + b2p.size
                          + m1.size + m2.size + G * B * noutp)

    out = pl.pallas_call(
        _sfe_kernel,
        out_shape=jax.ShapeDtypeStruct((G, B, noutp), jnp.float32),
        grid=(G,),
        in_specs=[
            pl.BlockSpec((None, B, emb), lambda g: (g, 0, 0)),    # x tile per group
            pl.BlockSpec((emb, Hp), lambda g: (0, 0)),            # w1 (resident)
            pl.BlockSpec((1, Hp), lambda g: (0, 0)),              # b1
            pl.BlockSpec((Hp, noutp), lambda g: (0, 0)),          # w2 (resident)
            pl.BlockSpec((1, noutp), lambda g: (0, 0)),           # b2
            pl.BlockSpec((None, B, Hp), lambda g: (g, 0, 0)),     # dropout mask 1
            pl.BlockSpec((None, B, noutp), lambda g: (g, 0, 0)),  # dropout mask 2
        ],
        out_specs=pl.BlockSpec((None, B, noutp), lambda g: (g, 0, 0)),
        compiler_params=pltpu.CompilerParams(
            dimension_semantics=("parallel",),          # shard groups across TCs (v7x)
            vmem_limit_bytes=32 * 1024 * 1024,          # fits v7x's scoped-VMEM budget
        ),
        cost_estimate=pl.CostEstimate(
            flops=flops,
            transcendentals=transcendentals,
            bytes_accessed=bytes_accessed,
        ),
    )(x, w1p, b1p, w2p, b2p, m1, m2)

    return out[:, :, :nout]   # drop lane-padding of the output features


def shared_feature_extractor(x, w1, b1, w2, b2, key):
    """Single mini-batch entry point: x is (B, emb) -> (B, nout)."""
    return shared_feature_extractor_groups(x[None], w1, b1, w2, b2, key)[0]


def init_params(key, emb_size, nout):
    """Deterministic synthetic init (PyTorch-Linear-like uniform fan-in bounds)."""
    k1, k2, k3, k4 = jax.random.split(key, 4)
    bound1 = 1.0 / jnp.sqrt(emb_size)
    bound2 = 1.0 / jnp.sqrt(HIDDEN_SIZE)
    w1 = jax.random.uniform(k1, (emb_size, HIDDEN_SIZE), jnp.float32, -bound1, bound1)
    b1 = jax.random.uniform(k2, (1, HIDDEN_SIZE), jnp.float32, -bound1, bound1)
    w2 = jax.random.uniform(k3, (HIDDEN_SIZE, nout), jnp.float32, -bound2, bound2)
    b2 = jax.random.uniform(k4, (1, nout), jnp.float32, -bound2, bound2)
    return w1, b1, w2, b2


if __name__ == "__main__":
    key = jax.random.PRNGKey(0)
    k_x, k_p, k_d = jax.random.split(key, 3)

    groups = 4        # independent mini-batches, one grid step each
    batch = 8
    emb_size = 32
    nout = 128

    x = jax.random.normal(k_x, (groups, batch, emb_size), jnp.float32)
    w1, b1, w2, b2 = init_params(k_p, emb_size, nout)

    out = shared_feature_extractor_groups(x, w1, b1, w2, b2, k_d)
    out = jax.block_until_ready(out)

    assert out.shape == (groups, batch, nout), out.shape
    assert out.dtype == jnp.float32, out.dtype
    assert bool(jnp.all(jnp.isfinite(out)))
    # BatchNorm (training mode) sanity: per-group, per-feature batch mean ~ 0.
    assert float(jnp.max(jnp.abs(jnp.mean(out, axis=1)))) < 1e-3

    # Single-mini-batch (2-D) entry point also works.
    out1 = jax.block_until_ready(shared_feature_extractor(x[0], w1, b1, w2, b2, k_d))
    assert out1.shape == (batch, nout), out1.shape

    print("KERNEL_OK")
</pallas_src>

<mosaic_0001>
module attributes {stable_mosaic.version = 11 : i64} {
  func.func @_sfe_kernel(%arg0: i32, %arg1: memref<1x8x32xf32, #tpu.memory_space<vmem>>, %arg2: memref<32x256xf32, #tpu.memory_space<vmem>>, %arg3: memref<1x256xf32, #tpu.memory_space<vmem>>, %arg4: memref<256x128xf32, #tpu.memory_space<vmem>>, %arg5: memref<1x128xf32, #tpu.memory_space<vmem>>, %arg6: memref<1x8x256xf32, #tpu.memory_space<vmem>>, %arg7: memref<1x8x128xf32, #tpu.memory_space<vmem>>, %arg8: memref<1x8x128xf32, #tpu.memory_space<vmem>>) attributes {dimension_semantics = [#tpu.dimension_semantics<parallel>], iteration_bounds = array<i64: 4>, scalar_prefetch = 0 : i64, scratch_operands = 0 : i64, tpu.core_type = #tpu.core_type<tc>, window_params = [{transform_indices = @transform_0, window_bounds = array<i64: 1, 8, 32>}, {pipeline_mode = #tpu.pipeline_mode<synchronous>, transform_indices = @transform_1, window_bounds = array<i64: 32, 256>}, {pipeline_mode = #tpu.pipeline_mode<synchronous>, transform_indices = @transform_2, window_bounds = array<i64: 1, 256>}, {pipeline_mode = #tpu.pipeline_mode<synchronous>, transform_indices = @transform_3, window_bounds = array<i64: 256, 128>}, {pipeline_mode = #tpu.pipeline_mode<synchronous>, transform_indices = @transform_4, window_bounds = array<i64: 1, 128>}, {transform_indices = @transform_5, window_bounds = array<i64: 1, 8, 256>}, {transform_indices = @transform_6, window_bounds = array<i64: 1, 8, 128>}, {transform_indices = @transform_7, window_bounds = array<i64: 1, 8, 128>}]} {
    %c0 = arith.constant 0 : index
    %c0_0 = arith.constant 0 : index
    %c0_1 = arith.constant 0 : index
    %0 = vector.load %arg1[%c0, %c0_0, %c0_1] : memref<1x8x32xf32, #tpu.memory_space<vmem>>, vector<1x8x32xf32>
    %1 = vector.shape_cast %0 : vector<1x8x32xf32> to vector<8x32xf32>
    %c0_2 = arith.constant 0 : index
    %c0_3 = arith.constant 0 : index
    %2 = vector.load %arg2[%c0_2, %c0_3] : memref<32x256xf32, #tpu.memory_space<vmem>>, vector<32x256xf32>
    %cst = arith.constant dense<0.000000e+00> : vector<8x256xf32>
    %3 = tpu.matmul %1, %2, %cst {dimension_numbers = #tpu.dot_dimension_numbers<[1], [0], [0], [1], [0, 0, 1, 1], [], []>} : vector<8x32xf32>, vector<32x256xf32>, vector<8x256xf32> -> vector<8x256xf32>
    %c0_4 = arith.constant 0 : index
    %c0_5 = arith.constant 0 : index
    %4 = vector.load %arg3[%c0_4, %c0_5] : memref<1x256xf32, #tpu.memory_space<vmem>>, vector<1x256xf32>
    %5 = vector.broadcast %4 : vector<1x256xf32> to vector<8x256xf32>
    %6 = arith.addf %3, %5 : vector<8x256xf32>
    %cst_6 = arith.constant 0.000000e+00 : f32
    %7 = vector.broadcast %cst_6 : f32 to vector<8x256xf32>
    %8 = arith.maximumf %6, %7 : vector<8x256xf32>
    %c0_7 = arith.constant 0 : index
    %c0_8 = arith.constant 0 : index
    %c0_9 = arith.constant 0 : index
    %9 = vector.load %arg6[%c0_7, %c0_8, %c0_9] : memref<1x8x256xf32, #tpu.memory_space<vmem>>, vector<1x8x256xf32>
    %10 = vector.shape_cast %9 : vector<1x8x256xf32> to vector<8x256xf32>
    %11 = arith.mulf %8, %10 : vector<8x256xf32>
    %cst_10 = arith.constant dense<0.000000e+00> : vector<256xf32>
    %12 = vector.multi_reduction <add>, %11, %cst_10 [0] : vector<8x256xf32> to vector<256xf32>
    %13 = vector.shape_cast %12 : vector<256xf32> to vector<1x256xf32>
    %cst_11 = arith.constant 8.000000e+00 : f32
    %14 = vector.broadcast %cst_11 : f32 to vector<1x256xf32>
    %15 = arith.divf %13, %14 : vector<1x256xf32>
    %16 = vector.broadcast %15 : vector<1x256xf32> to vector<8x256xf32>
    %17 = arith.subf %11, %16 : vector<8x256xf32>
    %18 = arith.mulf %17, %17 : vector<8x256xf32>
    %cst_12 = arith.constant dense<0.000000e+00> : vector<256xf32>
    %19 = vector.multi_reduction <add>, %18, %cst_12 [0] : vector<8x256xf32> to vector<256xf32>
    %20 = vector.shape_cast %19 : vector<256xf32> to vector<1x256xf32>
    %cst_13 = arith.constant 8.000000e+00 : f32
    %21 = vector.broadcast %cst_13 : f32 to vector<1x256xf32>
    %22 = arith.divf %20, %21 : vector<1x256xf32>
    %cst_14 = arith.constant 9.99999974E-6 : f32
    %23 = vector.broadcast %cst_14 : f32 to vector<1x256xf32>
    %24 = arith.addf %22, %23 : vector<1x256xf32>
    %25 = math.rsqrt %24 : vector<1x256xf32>
    %26 = vector.broadcast %25 : vector<1x256xf32> to vector<8x256xf32>
    %27 = arith.mulf %17, %26 : vector<8x256xf32>
    %c0_15 = arith.constant 0 : index
    %c0_16 = arith.constant 0 : index
    %28 = vector.load %arg4[%c0_15, %c0_16] : memref<256x128xf32, #tpu.memory_space<vmem>>, vector<256x128xf32>
    %cst_17 = arith.constant dense<0.000000e+00> : vector<8x128xf32>
    %29 = tpu.matmul %27, %28, %cst_17 {dimension_numbers = #tpu.dot_dimension_numbers<[1], [0], [0], [1], [0, 0, 1, 1], [], []>} : vector<8x256xf32>, vector<256x128xf32>, vector<8x128xf32> -> vector<8x128xf32>
    %c0_18 = arith.constant 0 : index
    %c0_19 = arith.constant 0 : index
    %30 = vector.load %arg5[%c0_18, %c0_19] : memref<1x128xf32, #tpu.memory_space<vmem>>, vector<1x128xf32>
    %31 = vector.broadcast %30 : vector<1x128xf32> to vector<8x128xf32>
    %32 = arith.addf %29, %31 : vector<8x128xf32>
    %cst_20 = arith.constant 0.000000e+00 : f32
    %33 = vector.broadcast %cst_20 : f32 to vector<8x128xf32>
    %34 = arith.maximumf %32, %33 : vector<8x128xf32>
    %c0_21 = arith.constant 0 : index
    %c0_22 = arith.constant 0 : index
    %c0_23 = arith.constant 0 : index
    %35 = vector.load %arg7[%c0_21, %c0_22, %c0_23] : memref<1x8x128xf32, #tpu.memory_space<vmem>>, vector<1x8x128xf32>
    %36 = vector.shape_cast %35 : vector<1x8x128xf32> to vector<8x128xf32>
    %37 = arith.mulf %34, %36 : vector<8x128xf32>
    %cst_24 = arith.constant dense<0.000000e+00> : vector<128xf32>
    %38 = vector.multi_reduction <add>, %37, %cst_24 [0] : vector<8x128xf32> to vector<128xf32>
    %39 = vector.shape_cast %38 : vector<128xf32> to vector<1x128xf32>
    %cst_25 = arith.constant 8.000000e+00 : f32
    %40 = vector.broadcast %cst_25 : f32 to vector<1x128xf32>
    %41 = arith.divf %39, %40 : vector<1x128xf32>
    %42 = vector.broadcast %41 : vector<1x128xf32> to vector<8x128xf32>
    %43 = arith.subf %37, %42 : vector<8x128xf32>
    %44 = arith.mulf %43, %43 : vector<8x128xf32>
    %cst_26 = arith.constant dense<0.000000e+00> : vector<128xf32>
    %45 = vector.multi_reduction <add>, %44, %cst_26 [0] : vector<8x128xf32> to vector<128xf32>
    %46 = vector.shape_cast %45 : vector<128xf32> to vector<1x128xf32>
    %cst_27 = arith.constant 8.000000e+00 : f32
    %47 = vector.broadcast %cst_27 : f32 to vector<1x128xf32>
    %48 = arith.divf %46, %47 : vector<1x128xf32>
    %cst_28 = arith.constant 9.99999974E-6 : f32
    %49 = vector.broadcast %cst_28 : f32 to vector<1x128xf32>
    %50 = arith.addf %48, %49 : vector<1x128xf32>
    %51 = math.rsqrt %50 : vector<1x128xf32>
    %52 = vector.broadcast %51 : vector<1x128xf32> to vector<8x128xf32>
    %53 = arith.mulf %43, %52 : vector<8x128xf32>
    %c0_29 = arith.constant 0 : index
    %c0_30 = arith.constant 0 : index
    %c0_31 = arith.constant 0 : index
    %54 = vector.load %arg8[%c0_29, %c0_30, %c0_31] : memref<1x8x128xf32, #tpu.memory_space<vmem>>, vector<1x8x128xf32>
    %55 = vector.shape_cast %54 : vector<1x8x128xf32> to vector<8x128xf32>
    %56 = vector.shape_cast %53 : vector<8x128xf32> to vector<1x8x128xf32>
    tpu.vector_store %arg8[%c0_29, %c0_30, %c0_31], %56 {strides = array<i32>} : memref<1x8x128xf32, #tpu.memory_space<vmem>>, vector<1x8x128xf32>,
    return
  }
  func.func @transform_0(%arg0: i32) -> (i32, i32, i32) {
    %c0_i32 = arith.constant 0 : i32
    %c0_i32_0 = arith.constant 0 : i32
    %c0_i32_1 = arith.constant 0 : i32
    return %arg0, %c0_i32, %c0_i32_0 : i32, i32, i32
  }
  func.func @transform_1(%arg0: i32) -> (i32, i32) {
    %c0_i32 = arith.constant 0 : i32
    %c0_i32_0 = arith.constant 0 : i32
    %c0_i32_1 = arith.constant 0 : i32
    return %c0_i32, %c0_i32_0 : i32, i32
  }
  func.func @transform_2(%arg0: i32) -> (i32, i32) {
    %c0_i32 = arith.constant 0 : i32
    %c0_i32_0 = arith.constant 0 : i32
    %c0_i32_1 = arith.constant 0 : i32
    return %c0_i32, %c0_i32_0 : i32, i32
  }
  func.func @transform_3(%arg0: i32) -> (i32, i32) {
    %c0_i32 = arith.constant 0 : i32
    %c0_i32_0 = arith.constant 0 : i32
    %c0_i32_1 = arith.constant 0 : i32
    return %c0_i32, %c0_i32_0 : i32, i32
  }
  func.func @transform_4(%arg0: i32) -> (i32, i32) {
    %c0_i32 = arith.constant 0 : i32
    %c0_i32_0 = arith.constant 0 : i32
    %c0_i32_1 = arith.constant 0 : i32
    return %c0_i32, %c0_i32_0 : i32, i32
  }
  func.func @transform_5(%arg0: i32) -> (i32, i32, i32) {
    %c0_i32 = arith.constant 0 : i32
    %c0_i32_0 = arith.constant 0 : i32
    %c0_i32_1 = arith.constant 0 : i32
    return %arg0, %c0_i32, %c0_i32_0 : i32, i32, i32
  }
  func.func @transform_6(%arg0: i32) -> (i32, i32, i32) {
    %c0_i32 = arith.constant 0 : i32
    %c0_i32_0 = arith.constant 0 : i32
    %c0_i32_1 = arith.constant 0 : i32
    return %arg0, %c0_i32, %c0_i32_0 : i32, i32, i32
  }
  func.func @transform_7(%arg0: i32) -> (i32, i32, i32) {
    %c0_i32 = arith.constant 0 : i32
    %c0_i32_0 = arith.constant 0 : i32
    %c0_i32_1 = arith.constant 0 : i32
    return %arg0, %c0_i32, %c0_i32_0 : i32, i32, i32
  }
}

</mosaic_0001>

<bundles_post_ra>
// kernel: shared_feature_extractor_groups.3
= control target key start
LH: loop header
LB: loop body
LE: loop exit
PB: predicated region body
PF: predicated region fallthrough
CT: control target
= control target key end

     0   :  { %12 = vsyncpa [#allocation3], 0  ;;  %s1164_s0 = inlined_call_operand.vmem [shape: f32[4,8,32], index: 0, kind: input, shape index: {}]   ;;  %s1165_s1 = inlined_call_operand.vmem [shape: f32[32,256], index: 1, kind: input, shape index: {}]   ;;  %s1166_s2 = inlined_call_operand.vmem [shape: f32[1,256], index: 2, kind: input, shape index: {}]   ;;  %s1167_s3 = inlined_call_operand.vmem [shape: f32[256,128], index: 3, kind: input, shape index: {}]   ;;  %s1168_s4 = inlined_call_operand.vmem [shape: f32[1,128], index: 4, kind: input, shape index: {}]   ;;  %s1169_s5 = inlined_call_operand.vmem [shape: f32[4,8,256], index: 5, kind: input, shape index: {}]   ;;  %s1170_s6 = inlined_call_operand.vmem [shape: f32[4,8,128], index: 6, kind: input, shape index: {}]   ;;  %s1171_s7 = inlined_call_operand.hbm [shape: f32[4,8,128], index: 7, kind: output, shape index: {}]  }
   0x1   :  { %14 = vsyncpa [#allocation3 + $0x1], 0  ;;  %s924_s24 = smov 0   ;;  %s926_s25 = smov 0  }
   0x2   :  { %s928_s26 = smov 0   ;;  %s930_s27 = smov 0  }
   0x3 LB: > { %s945_s28 = sadd.s32 4294967295, %s880_s27   ;;  %s681_s29 = sadd.s32 4294967294, %s880_s27   ;;  %s880_s27 = sphi %s930_s27, %s1177_s27   ;;  %s876_s26 = sphi %s928_s26, %s1176_s26   ;;  %s872_s25 = sphi %s926_s25, %s1175_s25   ;;  %s868_s24 = sphi %s924_s24, %s1174_s24  }
   0x4   : > { %s949_s30 = sadd.s32 1, %s880_s27   ;;  %s189_s8 = sadd.s32 1, %s876_s26 }
   0x5   : > { %s186_s9 = ssub.s32 %s880_s27, %s949_s30  ;;  %p199_p0 = scmp.ne.s32.totalorder %s876_s26, %s872_s25 }
   0x6   : > { %p187_p1 = scmp.eq.s32.totalorder %s186_s9, 0  ;;  %p200_p2 = scmp.eq.s32.totalorder %s945_s28, 3 }
   0x7   : > { %p205_p3 = scmp.ne.s32.totalorder %s872_s25, %s868_s24  ;;  %p206_p4 = scmp.eq.s32.totalorder %s681_s29, 3 }
   0x8   : > { %s960_s10 = scalar_select %p187_p1, %s876_s26, %s189_s8  }
   0x9   : > { %p962_p5 = por %p200_p2, %p199_p0  ;;  %p966_p6 = por %p206_p4, %p205_p3 }
   0xa   : > { %p684_p7 = scmp.ge.s32.totalorder %s880_s27, 1  ;;  %p258_p8 = scmp.lt.s32.totalorder %s880_s27, 5 }
   0xc   : > { %p259_p9 = pnand %p684_p7, %p258_p8 }
   0xd   : > { %v313_v0 = vld [vmem:[%s1165_s1 + $0x8] sm:$0xff] (!%p259_p9)  ;;  %v315_v1 = vld [vmem:[%s1165_s1 + $0x18] sm:$0xff] (!%p259_p9)  ;;  %v312_v2 = vld [vmem:[%s1165_s1] sm:$0xff] (!%p259_p9)  ;;  %p298_p10 = scmp.lt.s32.totalorder (!%p259_p9), %s945_s28, 3  ;;  %v882_v7 = vmov (!%p259_p9), 0.0   ;;  %vm332_vm0 = vcmask (!%p259_p9), 261120   ;;  %v322_v62 = vlaneseq (!%p259_p9) }
   0xe   : > { %262 = sbr.rel (%p259_p9) target bundleno = 575 (0x23f), region = 48  ;;  %v732_v3 = vpack.c.bf16 (!%p259_p9), %v315_v1, %v313_v0  ;;  %v314_v4 = vld [vmem:[%s1165_s1 + $0x10] sm:$0xff] (!%p259_p9)  ;;  %v317_v5 = vld [vmem:[%s1165_s1 + $0x28] sm:$0xff] (!%p259_p9)  ;;  %v319_v6 = vld [vmem:[%s1165_s1 + $0x38] sm:$0xff] (!%p259_p9)  ;;  %400 = vmatprep.mubr.f32.mxu0 (!%p259_p9), %v882_v7  ;;  %s693_s23 = sshll.u32 (!%p259_p9), %s945_s28, 7 }
   0xf   : > { %v734_v8 = vpack.c.bf16 (!%p259_p9), %v314_v4, %v312_v2  ;;  %v736_v9 = vpack.c.bf16 (!%p259_p9), %v319_v6, %v317_v5  ;;  %v316_v10 = vld [vmem:[%s1165_s1 + $0x20] sm:$0xff] (!%p259_p9)  ;;  %v318_v11 = vld [vmem:[%s1165_s1 + $0x30] sm:$0xff] (!%p259_p9)  ;;  %v469_v15 = vld [vmem:[%s1167_s3 + $0x88] sm:$0xff] (!%p259_p9)  ;;  %v323_v63 = vshrl.u32 (!%p259_p9), %v322_v62, 7  ;;  %s1122_s14 = scalar_lea.hbm (!%p259_p9), %s1171_s7, %s693_s23 }
  0x10   : > { %733 = vmatprep.subr.bf16.mxu0 (!%p259_p9), %v732_v3  ;;  %v738_v12 = vpack.c.bf16 (!%p259_p9), %v318_v11, %v316_v10  ;;  %v468_v14 = vld [vmem:[%s1167_s3 + $0x80] sm:$0xff] (!%p259_p9)  ;;  %v453_v18 = vld [vmem:[%s1167_s3 + $0x8] sm:$0xff] (!%p259_p9)  ;;  %v470_v19 = vld [vmem:[%s1167_s3 + $0x90] sm:$0xff] (!%p259_p9) }
  0x11   : > { %735 = vmatpush1.bf16.msra.mxu0 (!%p259_p9), %v734_v8  ;;  %v452_v16 = vld [vmem:[%s1167_s3] sm:$0xff] (!%p259_p9)  ;;  %v740_v17 = vpack.c.bf16 (!%p259_p9), %v469_v15, %v468_v14  ;;  %v471_v20 = vld [vmem:[%s1167_s3 + $0x98] sm:$0xff] (!%p259_p9)  ;;  %v454_v23 = vld [vmem:[%s1167_s3 + $0x10] sm:$0xff] (!%p259_p9)  ;;  %v324_v0 = vsub.s32 (!%p259_p9), 0, %v323_v63  ;;  %v328_v2 = vsub.s32 (!%p259_p9), 1, %v323_v63 }
  0x12   : > { %737 = vmatprep.subr.bf16.mxu0 (!%p259_p9), %v736_v9  ;;  %v742_v21 = vpack.c.bf16 (!%p259_p9), %v453_v18, %v452_v16  ;;  %v744_v22 = vpack.c.bf16 (!%p259_p9), %v471_v20, %v470_v19  ;;  %v455_v24 = vld [vmem:[%s1167_s3 + $0x18] sm:$0xff] (!%p259_p9)  ;;  %v472_v25 = vld [vmem:[%s1167_s3 + $0xa0] sm:$0xff] (!%p259_p9)  ;;  %v473_v26 = vld [vmem:[%s1167_s3 + $0xa8] sm:$0xff] (!%p259_p9) }
  0x13   : > { %741 = vmatprep.subr.bf16.mxu1 (!%p259_p9), %v740_v17  ;;  %v746_v27 = vpack.c.bf16 (!%p259_p9), %v455_v24, %v454_v23  ;;  %v748_v28 = vpack.c.bf16 (!%p259_p9), %v473_v26, %v472_v25  ;;  %v456_v29 = vld [vmem:[%s1167_s3 + $0x20] sm:$0xff] (!%p259_p9)  ;;  %v457_v30 = vld [vmem:[%s1167_s3 + $0x28] sm:$0xff] (!%p259_p9)  ;;  %v474_v31 = vld [vmem:[%s1167_s3 + $0xb0] sm:$0xff] (!%p259_p9) }
  0x14   : > { %743 = vmatpush3.bf16.msra.mxu1 (!%p259_p9), %v742_v21  ;;  %v475_v32 = vld [vmem:[%s1167_s3 + $0xb8] sm:$0xff] (!%p259_p9)  ;;  %v750_v33 = vpack.c.bf16 (!%p259_p9), %v457_v30, %v456_v29  ;;  %v458_v35 = vld [vmem:[%s1167_s3 + $0x30] sm:$0xff] (!%p259_p9)  ;;  %v476_v37 = vld [vmem:[%s1167_s3 + $0xc0] sm:$0xff] (!%p259_p9) }
  0x15   : > { %s998_s15 = scalar_select %p298_p10, %s945_s28, 3  ;;  %739 = vmatpush1.bf16.msra.mxu0 %v738_v12  ;;  %745 = vmatprep.subr.bf16.mxu1 %v744_v22  ;;  %v752_v34 = vpack.c.bf16 %v475_v32, %v474_v31  ;;  %v459_v36 = vld [vmem:[%s1167_s3 + $0x38] sm:$0xff]  ;;  %v477_v38 = vld [vmem:[%s1167_s3 + $0xc8] sm:$0xff]  ;;  %v460_v41 = vld [vmem:[%s1167_s3 + $0x40] sm:$0xff] }
  0x16   : > { %v754_v39 = vpack.c.bf16 %v459_v36, %v458_v35  ;;  %v756_v40 = vpack.c.bf16 %v477_v38, %v476_v37  ;;  %v461_v42 = vld [vmem:[%s1167_s3 + $0x48] sm:$0xff]  ;;  %v478_v43 = vld [vmem:[%s1167_s3 + $0xd0] sm:$0xff]  ;;  %v479_v44 = vld [vmem:[%s1167_s3 + $0xd8] sm:$0xff]  ;;  %s883_s28 = smov [#allocation2]  }
  0x17   : > { %s686_s16 = sshll.u32 %s998_s15, 3  ;;  %v758_v45 = vpack.c.bf16 %v461_v42, %v460_v41  ;;  %v760_v46 = vpack.c.bf16 %v479_v44, %v478_v43  ;;  %v462_v47 = vld [vmem:[%s1167_s3 + $0x50] sm:$0xff]  ;;  %v463_v48 = vld [vmem:[%s1167_s3 + $0x58] sm:$0xff]  ;;  %v480_v49 = vld [vmem:[%s1167_s3 + $0xe0] sm:$0xff]  ;;  %s696_s9 = sshll.u32 %s998_s15, 4 }
  0x18   : > { %s301_s19 = scalar_lea.vmem %s1164_s0, %s686_s16  ;;  %747 = vmatpush3.bf16.msra.mxu1 %v746_v27  ;;  %v481_v50 = vld [vmem:[%s1167_s3 + $0xe8] sm:$0xff]  ;;  %v762_v51 = vpack.c.bf16 %v463_v48, %v462_v47  ;;  %v464_v53 = vld [vmem:[%s1167_s3 + $0x60] sm:$0xff]  ;;  %v482_v55 = vld [vmem:[%s1167_s3 + $0xf0] sm:$0xff]  ;;  %s306_s17 = scalar_lea.vmem %s1169_s5, %s696_s9 }
  0x19   : > { %v311_v13 = vld [vmem:[%s301_s19] sm:$0xff]  ;;  %749 = vmatprep.subr.bf16.mxu1 %v748_v28  ;;  %v764_v52 = vpack.c.bf16 %v481_v50, %v480_v49  ;;  %v465_v54 = vld [vmem:[%s1167_s3 + $0x68] sm:$0xff]  ;;  %v483_v56 = vld [vmem:[%s1167_s3 + $0xf8] sm:$0xff]  ;;  %s310_s22 = scalar_lea.vmem %s1170_s6, %s686_s16  ;;  %s295_s15 = sand.u32 1, %s872_s25  }
  0x1a   : > { %690 = vmatmul.mubr.msk.f32.vlgmr.msra.gmra.mrb[0].mxu0 %vm332_vm0, %v311_v13  ;;  %v766_v57 = vpack.c.bf16 %v465_v54, %v464_v53  ;;  %v768_v58 = vpack.c.bf16 %v483_v56, %v482_v55  ;;  %v466_v59 = vld [vmem:[%s1167_s3 + $0x70] sm:$0xff]  ;;  %v467_v60 = vld [vmem:[%s1167_s3 + $0x78] sm:$0xff]  ;;  %v320_v1 = vld [vmem:[%s1166_s2] sm:$0x3]  ;;  %s685_s16 = sshll.u32 %s295_s15, 3  ;;  %s822_s19 = sshll.u32 %s883_s28, 4  ;;  %s823_s19 = int_to_ptr.vmem [resolvable:$false] %s822_s19 }
  0x1b   : > { %v770_v61 = vpack.c.bf16 %v467_v60, %v466_v59  ;;  %v325_v3 = vrot.slane %v320_v1, %v324_v0  ;;  %v329_v4 = vrot.slane %v320_v1, %v328_v2  ;;  %v409_v8 = vld [vmem:[%s306_s17] sm:$0xff]  ;;  %v410_v11 = vld [vmem:[%s306_s17 + $0x8] sm:$0xff]  ;;  %s297_s29 = scalar_lea.vmem [#allocation2], %s685_s16  ;;  %s585_s17 = scalar_lea.sflag [#allocation3], %s295_s15 }
  0x1c   : > { %751 = vmatpush3.bf16.msra.mxu1 %v750_v33  ;;  %v691_v54 = vld [vmem:[%s1168_s4] ss:$0 sm:$0xff]  ;;  %s598_s8 = sshll.u32 %s297_s29, 4  ;;  %s824_s20 = scalar_lea.vmem %s823_s19, 256  ;;  %s1124_s8 = int_to_ptr.vmem [resolvable:$true] %s598_s8 }
  0x1d   : > { %753 = vmatprep.subr.bf16.mxu1 %v752_v34  ;;  %s818_s18 = scalar_lea.vmem %s1124_s8, 128  ;;  %p825_p0 = scmp.lt.s32.totalorder %s1124_s8, %s823_s19 }
  0x1e   : > { %p819_p11 = scmp.ne.s32.totalorder %s1124_s8, %s818_s18  ;;  %p826_p1 = scmp.lt.s32.totalorder %s824_s20, %s818_s18 }
  0x20   : > { %755 = vmatpush3.bf16.msra.mxu1 %v754_v39  ;;  %p820_p12 = pnand %p819_p11, %p962_p5  ;;  %p827_p2 = por %p826_p1, %p825_p0 }
  0x21   : > { %757 = vmatprep.subr.bf16.mxu1 %v756_v40 }
  0x22   : > { %p821_p13 = pneg %p820_p12 }
  0x24   : > { %759 = vmatpush3.bf16.msra.mxu1 %v758_v45  ;;  %p828_p3 = pnand %p827_p2, %p821_p13 }
  0x25   : > { %761 = vmatprep.subr.bf16.mxu1 %v760_v46 }
  0x28   : > { %763 = vmatpush3.bf16.msra.mxu1 %v762_v51 }
  0x29   : > { %765 = vmatprep.subr.bf16.mxu1 %v764_v52 }
  0x2c   : > { %767 = vmatpush3.bf16.msra.mxu1 %v766_v57 }
  0x2d   : > { %769 = vmatprep.subr.bf16.mxu1 %v768_v58  ;;  %v562_v58 = vld [vmem:[%s310_s22] sm:$0xff] }
  0x30   : > { %771 = vmatpush3.bf16.msra.mxu1 %v770_v61 }
  0xed   : > { %v402_v5 = vpop.f32.mrb[0].mxu0 }
  0xee   : > { %v403_v6 = vadd.f32 %v402_v5, %v325_v3  ;;  %v404_v7 = vpop.f32.mrb[1].mxu0 }
  0xef   : > { %v405_v9 = vadd.f32 %v404_v7, %v329_v4 }
  0xf0   : > { %v407_v10 = vmax.f32 %v403_v6, 0.0 }
  0xf1   : > { %v408_v12 = vmax.f32 %v405_v9, 0.0 }
  0xf2   : > { %v411_v13 = vmul.f32 %v409_v8, %v407_v10 }
  0xf3   : > { %v412_v14 = vmul.f32 %v410_v11, %v408_v12 }
  0xf4   : > { %v413_v15 = vrot.slane %v411_v13, 4 }
  0xf5   : > { %v419_v16 = vrot.slane %v412_v14, 4 }
  0xf6   : > { %v414_v17 = vadd.f32 %v413_v15, %v411_v13 }
  0xf7   : > { %v420_v18 = vadd.f32 %v419_v16, %v412_v14 }
  0xf8   : > { %v415_v19 = vrot.slane %v414_v17, 2 }
  0xf9   : > { %v421_v20 = vrot.slane %v420_v18, 2 }
  0xfa   : > { %v416_v21 = vadd.f32 %v415_v19, %v414_v17 }
  0xfb   : > { %v422_v22 = vadd.f32 %v421_v20, %v420_v18 }
  0xfc   : > { %v417_v23 = vrot.slane %v416_v21, 1 }
  0xfd   : > { %v423_v24 = vrot.slane %v422_v22, 1 }
  0xfe   : > { %v418_v25 = vadd.f32 %v417_v23, %v416_v21 }
  0xff   : > { %v424_v26 = vadd.f32 %v423_v24, %v422_v22 }
 0x100   : > { %v426_v27 = vmul.f32 0.125, %v418_v25 }
 0x101   : > { %v427_v28 = vmul.f32 0.125, %v424_v26 }
 0x102   : > { %v428_v29 = vsub.f32 %v411_v13, %v426_v27 }
 0x103   : > { %v429_v30 = vsub.f32 %v412_v14, %v427_v28 }
 0x104   : > { %v430_v31 = vmul.f32 %v428_v29, %v428_v29 }
 0x105   : > { %v431_v32 = vmul.f32 %v429_v30, %v429_v30 }
 0x106   : > { %v432_v33 = vrot.slane %v430_v31, 4 }
 0x107   : > { %v438_v34 = vrot.slane %v431_v32, 4 }
 0x108   : > { %v433_v35 = vadd.f32 %v432_v33, %v430_v31 }
 0x109   : > { %v439_v36 = vadd.f32 %v438_v34, %v431_v32 }
 0x10a   : > { %v434_v37 = vrot.slane %v433_v35, 2 }
 0x10b   : > { %v440_v38 = vrot.slane %v439_v36, 2 }
 0x10c   : > { %v435_v39 = vadd.f32 %v434_v37, %v433_v35 }
 0x10d   : > { %v441_v40 = vadd.f32 %v440_v38, %v439_v36 }
 0x10e   : > { %v436_v41 = vrot.slane %v435_v39, 1 }
 0x10f   : > { %v442_v42 = vrot.slane %v441_v40, 1 }
 0x110   : > { %v437_v43 = vadd.f32 %v436_v41, %v435_v39 }
 0x111   : > { %v443_v44 = vadd.f32 %v442_v42, %v441_v40 }
 0x112   : > { %v444_v45 = vmul.f32 0.125, %v437_v43 }
 0x113   : > { %v445_v46 = vmul.f32 0.125, %v443_v44 }
 0x114   : > { %v446_v47 = vadd.f32 1e-05, %v444_v45 }
 0x115   : > { %v447_v48 = vadd.f32 1e-05, %v445_v46 }
 0x116   : > { %812 = vrsqrt.f32 %v446_v47 }
 0x117   : > { %814 = vrsqrt.f32 %v447_v48 }
 0x120   : > { %v813_v49 = vpop.eup %812 }
 0x121   : > { %v815_v50 = vpop.eup %814  ;;  %v450_v52 = vmul.f32 %v813_v49, %v428_v29 }
 0x122   : > { %v451_v51 = vmul.f32 %v815_v50, %v429_v30 }
 0x124   : > { %555 = vmatprep.mubr.f32.mxu1 %v451_v51 }
 0x125   : > { %556 = vmatmul.mubr.f32.vlgmr.msra.gmra.mrb[0].mxu1 %v450_v52 }
 0x1f8   : > { %v729_v53 = vpop.f32.mrb[0].mxu1 }
 0x1f9   : > { %v730_v55 = vpop.f32.mrb[1].mxu1 }
 0x1fa   : > { %v731_v56 = vadd.f32 %v730_v55, %v729_v53 }
 0x1fc   : > { %v558_v57 = vadd.f32 %v731_v56, %v691_v54 }
 0x1fe   : > { %v561_v59 = vmax.f32 %v558_v57, 0.0 }
 0x200   : > { %v563_v60 = vmul.f32 %v562_v58, %v561_v59 }
 0x202   : > { %v564_v61 = vrot.slane %v563_v60, 4 }
 0x204   : > { %v565_v62 = vadd.f32 %v564_v61, %v563_v60 }
 0x206   : > { %v566_v63 = vrot.slane %v565_v62, 2 }
 0x208   : > { %v567_v0 = vadd.f32 %v566_v63, %v565_v62 }
 0x20a   : > { %v568_v1 = vrot.slane %v567_v0, 1 }
 0x20c   : > { %v569_v2 = vadd.f32 %v568_v1, %v567_v0 }
 0x20e   : > { %v570_v3 = vmul.f32 0.125, %v569_v2 }
 0x210   : > { %v571_v4 = vsub.f32 %v563_v60, %v570_v3 }
 0x212   : > { %v572_v5 = vmul.f32 %v571_v4, %v571_v4 }
 0x214   : > { %v573_v6 = vrot.slane %v572_v5, 4 }
 0x216   : > { %v574_v7 = vadd.f32 %v573_v6, %v572_v5 }
 0x218   : > { %v575_v8 = vrot.slane %v574_v7, 2 }
 0x21a   : > { %v576_v9 = vadd.f32 %v575_v8, %v574_v7 }
 0x21c   : > { %v577_v10 = vrot.slane %v576_v9, 1 }
 0x21e   : > { %v578_v11 = vadd.f32 %v577_v10, %v576_v9 }
 0x220   : > { %v579_v12 = vmul.f32 0.125, %v578_v11 }
 0x222   : > { %v580_v13 = vadd.f32 1e-05, %v579_v12 }
 0x224   : > { %816 = vrsqrt.f32 %v580_v13 }
 0x22e   : > { %v817_v14 = vpop.eup %816 }
 0x22f   : > { %v582_v15 = vmul.f32 %v817_v14, %v571_v4 }
 0x231   : > { %583 = vst [vmem:[%s297_s29] sm:$0xff] %v582_v15 }
 0x232   : > { %831 = shalt.err (!%p828_p3)
}
 0x233   : > { %s832_s21 = scalar_lea.hbm %s1122_s14, 128  ;;  %s836_s16 = scalar_lea.hbm %s1171_s7, 512 }
 0x234   : > { %p833_p4 = scmp.ne.s32.totalorder %s1122_s14, %s832_s21  ;;  %p837_p9 = scmp.lt.u32.totalorder %s1122_s14, %s1171_s7 }
 0x235   : > { %p838_p10 = scmp.lt.u32.totalorder %s836_s16, %s832_s21  ;;  %p840_p12 = scmp.lt.u32.totalorder %s832_s21, %s1122_s14 }
 0x236   : > { %p834_p7 = pnand %p833_p4, %p962_p5 }
 0x237   : > { %p839_p11 = por %p838_p10, %p837_p9 }
 0x238   : > { %p835_p8 = pneg %p834_p7 }
 0x239   : > { %p841_p13 = por %p840_p12, %p839_p11 }
 0x23b   : > { %p842_p0 = pnand %p841_p13, %p835_p8 }
 0x23d   : > { %845 = shalt.err (!%p842_p0)
}
 0x23e   : > { %772 = dma.vmem_to_hbm [thread:$0]  (%p962_p5), %s1124_s8, 128, %s1122_s14, %s585_s17  }
 0x23f PF: > { %p778_p1 = scmp.ge.s32.totalorder %s880_s27, 2  ;;  %s610_s9 = sand.u32 1, %s868_s24  }
 0x240   : > { %s611_s13 = scalar_lea.sflag [#allocation3], %s610_s9 }
 0x241   : > { %p775_p2 = pnand %p778_p1, %p966_p6 }
 0x243   : > { %863 = dma.done.wait (!%p775_p2), %s611_s13, 128  }
 0x244   : > { %865 = vsyncadd (!%p775_p2), %s611_s13, 4294967168  ;;  %p17_p3 = scmp.ge.s32.totalorder %s949_s30, 6   ;;  %s1174_s24 = smov %s872_s25 }
 0x245   : > { %s1175_s25 = smov %s876_s26  ;;  %s1176_s26 = smov %s960_s10 }
 0x246   : > { %s1177_s27 = smov %s949_s30  ;;  %19 = sbr.rel (!%p17_p3) target bundleno = 3 (0x3), region = 89 }
 0x24d   :  { %616 = vsyncpa [#allocation3], 1 }
 0x24e   :  { %618 = vsyncpa [#allocation3 + $0x1], 1 }

</bundles_post_ra>
